<compile_context>
chip_gen: v6e
topology: v6e:2x2x1
jax: 0.10.0
libtpu: 0.0.40
codegen_flags: <defaults>
</compile_context>

<pallas_src>
import jax
import jax.numpy as jnp
import numpy as np
from jax.experimental import pallas as pl
from jax.experimental.pallas import tpu as pltpu


def attention_kernel(x_ref, w_ref, o_ref, m_acc, l_acc, num_acc):
    # x_ref   : (BB, tT, D) VMEM block  (BB batch rows x tT sequence tile)
    # w_ref   : (1, 1, D)   VMEM        score weight (resident, broadcast)
    # o_ref   : (BB, D)     VMEM block  pooled output (written at last T tile)
    # m_acc   : (BB, 1) f32 scratch     running max of scores
    # l_acc   : (BB, 1) f32 scratch     running softmax denominator
    # num_acc : (BB, D) f32 scratch     running softmax-weighted sum
    ti = pl.program_id(1)

    @pl.when(ti == 0)
    def _():
        m_acc[...] = jnp.full_like(m_acc, -jnp.inf)
        l_acc[...] = jnp.zeros_like(l_acc)
        num_acc[...] = jnp.zeros_like(num_acc)

    x = x_ref[...].astype(jnp.float32)          # (BB, tT, D)
    w = w_ref[...].astype(jnp.float32)          # (1, 1, D)

    # Scores for this tile: VPU multiply + lane reduce (no MXU).
    # Bias omitted: softmax over the sequence axis is shift-invariant.
    s = jnp.sum(x * w, axis=-1, keepdims=True)  # (BB, tT, 1)

    # Online (streaming) softmax update, numerically stable across T tiles.
    m_prev = m_acc[...]                                            # (BB, 1)
    m_new = jnp.maximum(m_prev, jnp.max(s, axis=1))                # (BB, 1)
    alpha = jnp.exp(m_prev - m_new)                                # (BB, 1)
    e = jnp.exp(s - m_new[:, :, None])                             # (BB, tT, 1)

    l_acc[...] = alpha * l_acc[...] + jnp.sum(e, axis=1)           # (BB, 1)
    num_acc[...] = alpha * num_acc[...] + jnp.sum(e * x, axis=1)   # (BB, D)
    m_acc[...] = m_new

    @pl.when(ti == pl.num_programs(1) - 1)
    def _():
        # Deferred normalization: one reciprocal + one D-wide multiply.
        # (approx=True is viable in production; exact here to keep the 1e-5
        #  correctness check meaningful — it is a single (BB,1) op anyway.)
        inv = pl.reciprocal(l_acc[...], approx=False)              # (BB, 1)
        o_ref[...] = (num_acc[...] * inv).astype(o_ref.dtype)


def _largest_divisor_leq(n, cap):
    cap = max(1, min(n, cap))
    while n % cap:
        cap -= 1
    return cap


def attention_pallas(x, w, b=None, *, block_b=None, block_t=None,
                     vmem_budget_bytes=8 * 1024 * 1024):
    """x: (B, T, D); w: (1, D) score weight; b: (1,) score bias (ignored —
    softmax over the sequence axis is shift-invariant, so the result is
    mathematically identical without it)."""
    del b
    B, T, D = x.shape
    itemsize = jnp.dtype(x.dtype).itemsize

    if block_b is None or block_t is None:
        # Budget one double-buffered x block; prefer full batch, tile T.
        max_elems = max(1, vmem_budget_bytes // (2 * itemsize))
        bb = B
        tt = _largest_divisor_leq(T, max(1, max_elems // max(1, bb * D)))
        if bb * tt * D > max_elems:
            bb = _largest_divisor_leq(B, max(1, max_elems // max(1, tt * D)))
        block_b = block_b or bb
        block_t = block_t or tt
    assert B % block_b == 0 and T % block_t == 0

    grid = (B // block_b, T // block_t)
    w3 = w.reshape(1, 1, D).astype(x.dtype)

    out = pl.pallas_call(
        attention_kernel,
        out_shape=jax.ShapeDtypeStruct((B, D), x.dtype),
        grid_spec=pltpu.PrefetchScalarGridSpec(
            num_scalar_prefetch=0,
            grid=grid,
            in_specs=[
                pl.BlockSpec((block_b, block_t, D),
                             lambda bi, ti: (bi, ti, 0)),
                pl.BlockSpec((1, 1, D), lambda bi, ti: (0, 0, 0)),
            ],
            out_specs=pl.BlockSpec((block_b, D), lambda bi, ti: (bi, 0)),
            scratch_shapes=[
                pltpu.VMEM((block_b, 1), jnp.float32),   # running max
                pltpu.VMEM((block_b, 1), jnp.float32),   # running denom
                pltpu.VMEM((block_b, D), jnp.float32),   # running numerator
            ],
        ),
        compiler_params=pltpu.CompilerParams(
            # batch axis parallel (megacore on v7x), sequence axis is the
            # reduction -> arbitrary and last.
            dimension_semantics=("parallel", "arbitrary"),
            # Raise v5e's 16 MiB default; equals the v6e/v7x default (safe).
            vmem_limit_bytes=32 * 1024 * 1024,
        ),
    )(x, w3)
    return out


def attention_ref(x, w, b):
    # Plain-JAX reference mirroring the PyTorch forward (bias included).
    s = jnp.einsum("btd,od->bto", x, w) + b          # (B, T, 1)
    p = jax.nn.softmax(s, axis=1)                    # softmax over sequence
    return jnp.sum(p * x, axis=1)                    # (B, D)


if __name__ == "__main__":
    B, T, D = 2, 8, 32

    key = jax.random.PRNGKey(0)
    kx, kw, kb = jax.random.split(key, 3)

    x = jax.random.normal(kx, (B, T, D), dtype=jnp.float32)

    # Deterministic init for nn.Linear(dim, 1): U(-1/sqrt(D), 1/sqrt(D))
    bound = 1.0 / np.sqrt(D)
    w = jax.random.uniform(kw, (1, D), minval=-bound, maxval=bound,
                           dtype=jnp.float32)
    b = jax.random.uniform(kb, (1,), minval=-bound, maxval=bound,
                           dtype=jnp.float32)

    out = attention_pallas(x, w, b)
    out = jax.block_until_ready(out)

    ref = attention_ref(x, w, b)
    np.testing.assert_allclose(np.asarray(out), np.asarray(ref),
                               rtol=1e-5, atol=1e-5)
    print("KERNEL_OK")
</pallas_src>

<mosaic_0001>
module attributes {stable_mosaic.version = 11 : i64} {
  func.func @attention_kernel(%arg0: i32, %arg1: i32, %arg2: memref<2x8x32xf32, #tpu.memory_space<vmem>>, %arg3: memref<1x1x32xf32, #tpu.memory_space<vmem>>, %arg4: memref<2x32xf32, #tpu.memory_space<vmem>>, %arg5: memref<2x1xf32, #tpu.memory_space<vmem>>, %arg6: memref<2x1xf32, #tpu.memory_space<vmem>>, %arg7: memref<2x32xf32, #tpu.memory_space<vmem>>) attributes {dimension_semantics = [#tpu.dimension_semantics<parallel>, #tpu.dimension_semantics<arbitrary>], iteration_bounds = array<i64: 1, 1>, scalar_prefetch = 0 : i64, scratch_operands = 3 : i64, tpu.core_type = #tpu.core_type<tc>, window_params = [{transform_indices = @transform_0, window_bounds = array<i64: 2, 8, 32>}, {pipeline_mode = #tpu.pipeline_mode<synchronous>, transform_indices = @transform_1, window_bounds = array<i64: 1, 1, 32>}, {transform_indices = @transform_2, window_bounds = array<i64: 2, 32>}]} {
    %c0_i32 = arith.constant 0 : i32
    %0 = arith.cmpi eq, %arg1, %c0_i32 : i32
    %1 = arith.extui %0 : i1 to i32
    %c0_i32_0 = arith.constant 0 : i32
    %2 = arith.cmpi ne, %1, %c0_i32_0 : i32
    scf.if %2 {
      %cst_23 = arith.constant 0xFF800000 : f32
      %35 = vector.broadcast %cst_23 : f32 to vector<2x1xf32>
      %c0_24 = arith.constant 0 : index
      %c0_25 = arith.constant 0 : index
      %36 = vector.load %arg5[%c0_24, %c0_25] : memref<2x1xf32, #tpu.memory_space<vmem>>, vector<2x1xf32>
      tpu.vector_store %arg5[%c0_24, %c0_25], %35 {strides = array<i32>} : memref<2x1xf32, #tpu.memory_space<vmem>>, vector<2x1xf32>,
      %cst_26 = arith.constant 0.000000e+00 : f32
      %37 = vector.broadcast %cst_26 : f32 to vector<2x1xf32>
      %c0_27 = arith.constant 0 : index
      %c0_28 = arith.constant 0 : index
      %38 = vector.load %arg6[%c0_27, %c0_28] : memref<2x1xf32, #tpu.memory_space<vmem>>, vector<2x1xf32>
      tpu.vector_store %arg6[%c0_27, %c0_28], %37 {strides = array<i32>} : memref<2x1xf32, #tpu.memory_space<vmem>>, vector<2x1xf32>,
      %cst_29 = arith.constant 0.000000e+00 : f32
      %39 = vector.broadcast %cst_29 : f32 to vector<2x32xf32>
      %c0_30 = arith.constant 0 : index
      %c0_31 = arith.constant 0 : index
      %40 = vector.load %arg7[%c0_30, %c0_31] : memref<2x32xf32, #tpu.memory_space<vmem>>, vector<2x32xf32>
      tpu.vector_store %arg7[%c0_30, %c0_31], %39 {strides = array<i32>} : memref<2x32xf32, #tpu.memory_space<vmem>>, vector<2x32xf32>,
    } else {
    }
    %c0 = arith.constant 0 : index
    %c0_1 = arith.constant 0 : index
    %c0_2 = arith.constant 0 : index
    %3 = vector.load %arg2[%c0, %c0_1, %c0_2] : memref<2x8x32xf32, #tpu.memory_space<vmem>>, vector<2x8x32xf32>
    %c0_3 = arith.constant 0 : index
    %c0_4 = arith.constant 0 : index
    %c0_5 = arith.constant 0 : index
    %4 = vector.load %arg3[%c0_3, %c0_4, %c0_5] : memref<1x1x32xf32, #tpu.memory_space<vmem>>, vector<1x1x32xf32>
    %5 = vector.broadcast %4 : vector<1x1x32xf32> to vector<2x8x32xf32>
    %6 = arith.mulf %3, %5 : vector<2x8x32xf32>
    %cst = arith.constant dense<0.000000e+00> : vector<2x8xf32>
    %7 = vector.multi_reduction <add>, %6, %cst [2] : vector<2x8x32xf32> to vector<2x8xf32>
    %8 = vector.shape_cast %7 : vector<2x8xf32> to vector<2x8x1xf32>
    %c0_6 = arith.constant 0 : index
    %c0_7 = arith.constant 0 : index
    %9 = vector.load %arg5[%c0_6, %c0_7] : memref<2x1xf32, #tpu.memory_space<vmem>>, vector<2x1xf32>
    %cst_8 = arith.constant dense<0xFF800000> : vector<2x1xf32>
    %10 = vector.multi_reduction <maximumf>, %8, %cst_8 [1] : vector<2x8x1xf32> to vector<2x1xf32>
    %11 = arith.maximumf %9, %10 : vector<2x1xf32>
    %12 = arith.subf %9, %11 : vector<2x1xf32>
    %13 = math.exp %12 : vector<2x1xf32>
    %14 = vector.shape_cast %11 : vector<2x1xf32> to vector<2x1x1xf32>
    %15 = vector.broadcast %14 : vector<2x1x1xf32> to vector<2x8x1xf32>
    %16 = arith.subf %8, %15 : vector<2x8x1xf32>
    %17 = math.exp %16 : vector<2x8x1xf32>
    %c0_9 = arith.constant 0 : index
    %c0_10 = arith.constant 0 : index
    %18 = vector.load %arg6[%c0_9, %c0_10] : memref<2x1xf32, #tpu.memory_space<vmem>>, vector<2x1xf32>
    %19 = arith.mulf %13, %18 : vector<2x1xf32>
    %cst_11 = arith.constant dense<0.000000e+00> : vector<2x1xf32>
    %20 = vector.multi_reduction <add>, %17, %cst_11 [1] : vector<2x8x1xf32> to vector<2x1xf32>
    %21 = arith.addf %19, %20 : vector<2x1xf32>
    %c0_12 = arith.constant 0 : index
    %c0_13 = arith.constant 0 : index
    %22 = vector.load %arg6[%c0_12, %c0_13] : memref<2x1xf32, #tpu.memory_space<vmem>>, vector<2x1xf32>
    tpu.vector_store %arg6[%c0_12, %c0_13], %21 {strides = array<i32>} : memref<2x1xf32, #tpu.memory_space<vmem>>, vector<2x1xf32>,
    %c0_14 = arith.constant 0 : index
    %c0_15 = arith.constant 0 : index
    %23 = vector.load %arg7[%c0_14, %c0_15] : memref<2x32xf32, #tpu.memory_space<vmem>>, vector<2x32xf32>
    %24 = vector.broadcast %13 : vector<2x1xf32> to vector<2x32xf32>
    %25 = arith.mulf %24, %23 : vector<2x32xf32>
    %26 = vector.broadcast %17 : vector<2x8x1xf32> to vector<2x8x32xf32>
    %27 = arith.mulf %26, %3 : vector<2x8x32xf32>
    %cst_16 = arith.constant dense<0.000000e+00> : vector<2x32xf32>
    %28 = vector.multi_reduction <add>, %27, %cst_16 [1] : vector<2x8x32xf32> to vector<2x32xf32>
    %29 = arith.addf %25, %28 : vector<2x32xf32>
    %c0_17 = arith.constant 0 : index
    %c0_18 = arith.constant 0 : index
    %30 = vector.load %arg7[%c0_17, %c0_18] : memref<2x32xf32, #tpu.memory_space<vmem>>, vector<2x32xf32>
    tpu.vector_store %arg7[%c0_17, %c0_18], %29 {strides = array<i32>} : memref<2x32xf32, #tpu.memory_space<vmem>>, vector<2x32xf32>,
    %c0_19 = arith.constant 0 : index
    %c0_20 = arith.constant 0 : index
    %31 = vector.load %arg5[%c0_19, %c0_20] : memref<2x1xf32, #tpu.memory_space<vmem>>, vector<2x1xf32>
    tpu.vector_store %arg5[%c0_19, %c0_20], %11 {strides = array<i32>} : memref<2x1xf32, #tpu.memory_space<vmem>>, vector<2x1xf32>,
    %c0_i32_21 = arith.constant 0 : i32
    %32 = arith.cmpi eq, %arg1, %c0_i32_21 : i32
    %33 = arith.extui %32 : i1 to i32
    %c0_i32_22 = arith.constant 0 : i32
    %34 = arith.cmpi ne, %33, %c0_i32_22 : i32
    scf.if %34 {
      %c0_23 = arith.constant 0 : index
      %c0_24 = arith.constant 0 : index
      %35 = vector.load %arg6[%c0_23, %c0_24] : memref<2x1xf32, #tpu.memory_space<vmem>>, vector<2x1xf32>
      %36 = tpu.reciprocal %35 : vector<2x1xf32> -> vector<2x1xf32>
      %c0_25 = arith.constant 0 : index
      %c0_26 = arith.constant 0 : index
      %37 = vector.load %arg7[%c0_25, %c0_26] : memref<2x32xf32, #tpu.memory_space<vmem>>, vector<2x32xf32>
      %38 = vector.broadcast %36 : vector<2x1xf32> to vector<2x32xf32>
      %39 = arith.mulf %37, %38 : vector<2x32xf32>
      %c0_27 = arith.constant 0 : index
      %c0_28 = arith.constant 0 : index
      %40 = vector.load %arg4[%c0_27, %c0_28] : memref<2x32xf32, #tpu.memory_space<vmem>>, vector<2x32xf32>
      tpu.vector_store %arg4[%c0_27, %c0_28], %39 {strides = array<i32>} : memref<2x32xf32, #tpu.memory_space<vmem>>, vector<2x32xf32>,
    } else {
    }
    return
  }
  func.func @transform_0(%arg0: i32, %arg1: i32) -> (i32, i32, i32) {
    %c0_i32 = arith.constant 0 : i32
    %c0_i32_0 = arith.constant 0 : i32
    return %arg0, %arg1, %c0_i32 : i32, i32, i32
  }
  func.func @transform_1(%arg0: i32, %arg1: i32) -> (i32, i32, i32) {
    %c0_i32 = arith.constant 0 : i32
    %c0_i32_0 = arith.constant 0 : i32
    %c0_i32_1 = arith.constant 0 : i32
    %c0_i32_2 = arith.constant 0 : i32
    return %c0_i32, %c0_i32_0, %c0_i32_1 : i32, i32, i32
  }
  func.func @transform_2(%arg0: i32, %arg1: i32) -> (i32, i32) {
    %c0_i32 = arith.constant 0 : i32
    %c0_i32_0 = arith.constant 0 : i32
    return %arg0, %c0_i32 : i32, i32
  }
}

</mosaic_0001>

<bundles_post_ra>
// kernel: tpu_custom_call.1
= control target key start
LH: loop header
LB: loop body
LE: loop exit
PB: predicated region body
PF: predicated region fallthrough
CT: control target
= control target key end

     0   :  { %7 = vsyncpa [#allocation6], 0  ;;  %s324_s0 = inlined_call_operand.hbm [shape: f32[2,8,32], index: 0, kind: input, shape index: {}]   ;;  %s325_s1 = inlined_call_operand.vmem [shape: f32[1,1,32], index: 1, kind: input, shape index: {}]   ;;  %s326_s2 = inlined_call_operand.hbm [shape: f32[2,32], index: 2, kind: output, shape index: {}]  }
   0x1   :  { %8 = vsyncpa [#allocation7], 0  ;;  %s270_s9 = smov [#allocation5]  }
   0x2   :  { %s14_s10 = sshll.u32 %s270_s9, 4  ;;  %s15_s10 = int_to_ptr.vmem [resolvable:$true] %s14_s10 }
   0x3   :  { %s234_s11 = scalar_lea.vmem %s15_s10, 256  ;;  %p239_p1 = scmp.lt.s32.totalorder %s15_s10, %s15_s10 }
   0x4   :  { %p235_p0 = scmp.ne.s32.totalorder %s15_s10, %s234_s11  ;;  %p240_p2 = scmp.lt.s32.totalorder %s234_s11, %s234_s11 }
   0x6   :  { %p241_p3 = por %p240_p2, %p239_p1 }
   0x8   :  { %p242_p4 = pnand %p241_p3, %p235_p0 }
   0xa   :  { %245 = shalt.err (!%p242_p4)
}
   0xb   :  { %s271_s12 = smov 128   ;;  %s272_s13 = smov 8  }
   0xc   :  { %20 = dma.hbm_to_vmem [thread:$0]  %s324_s0, 256, %s15_s10, [#allocation6], %s271_s12, %s271_s12, %s272_s13  }
   0xd   :  { %266 = dma.done.wait [#allocation6], 256  }
   0xe   :  { %267 = vsyncadd [#allocation6], 4294967040  ;;  %v296_v0 = vld [vmem:[#allocation5] sm:$0xff]  ;;  %v207_v1 = vld [vmem:[%s325_s1] ss:$0 sm:$0xff]  ;;  %vm46_vm0 = vcmask 261120   ;;  %v79_v20 = vlaneseq }
   0xf   :  { %v301_v2 = vld [vmem:[#allocation5 + $0x8] sm:$0xff]  ;;  %v44_v3 = vmul.f32 %v207_v1, %v296_v0  ;;  %vm30_vm1 = vcmask 1024   ;;  %v273_v7 = vmov -inf   ;;  %v274_v8 = vmov 0.0   ;;  %s277_s0 = smov [#allocation8]  }
  0x10   :  { %v45_v4 = vmul.f32 %v207_v1, %v301_v2  ;;  %31 = vst.msk [vmem:[#allocation2] sm:$0x3] %vm30_vm1, %v273_v7  ;;  %32 = vst.msk [vmem:[#allocation3] sm:$0x3] %vm30_vm1, %v274_v8  ;;  %v275_v9 = vmov 0   ;;  %vm33_vm2 = vcmask 254976  }
  0x11   :  { %v47_v5 = vsel %vm46_vm0, %v44_v3, 0.0  ;;  %217 = vset.pattern.permute.xlu0 %v275_v9  ;;  %216 = vset.pattern.permute.xlu1 %v275_v9  ;;  %34 = vst.msk [vmem:[#allocation4] sm:$0x3] %vm33_vm2, %v274_v8  ;;  %v276_v18 = vmov 1966171168   ;;  %v80_v25 = vshrl.u32 %v79_v20, 7 }
  0x12   :  { %48 = vadd.xlane.f32.xlu0 %v47_v5  ;;  %v50_v6 = vsel %vm46_vm0, %v45_v4, 0.0  ;;  %v77_v19 = vunpack.c.l.s4 %v276_v18  ;;  %vm68_vm3 = vcmask 1041409   ;;  %vm116_vm4 = vcmask 7168   ;;  %s198_s1 = sshll.u32 %s277_s0, 4  ;;  %s199_s1 = int_to_ptr.vmem [resolvable:$true] %s198_s1 }
  0x13   :  { %v100_v33 = vsub.s32 0, %v80_v25  ;;  %s246_s18 = scalar_lea.vmem %s199_s1, 32  ;;  %p251_p6 = scmp.lt.s32.totalorder %s199_s1, %s199_s1 }
  0x14   :  { %v78_v24 = vunpack.c.0.s8 %v77_v19  ;;  %p247_p5 = scmp.ne.s32.totalorder %s199_s1, %s246_s18  ;;  %p252_p7 = scmp.lt.s32.totalorder %s246_s18, %s246_s18 }
  0x16   :  { %51 = vadd.xlane.f32.xlu0 %v50_v6  ;;  %v81_v30 = vsub.s32 %v78_v24, %v80_v25  ;;  %p253_p8 = por %p252_p7, %p251_p6 }
  0x17   :  { %v53_v28 = vld [vmem:[#allocation2] sm:$0x3]  ;;  %v114_v60 = vld [vmem:[#allocation3] sm:$0x3] }
  0x18   :  { %p254_p9 = pnand %p253_p8, %p247_p5 }
  0x9b   :  { %v49_v10 = vpop.xlane.xlu0 %48 }
  0x9c   :  { %v54_v11 = vrot.slane %v49_v10, 4 }
  0x9e   :  { %v55_v12 = vmax.f32 %v49_v10, %v54_v11 }
  0x9f   :  { %v52_v13 = vpop.xlane.xlu0 %51 }
  0xa0   :  { %v56_v14 = vrot.slane %v55_v12, 2  ;;  %v60_v15 = vrot.slane %v52_v13, 4 }
  0xa2   :  { %v57_v16 = vmax.f32 %v55_v12, %v56_v14  ;;  %v61_v17 = vmax.f32 %v52_v13, %v60_v15 }
  0xa4   :  { %v62_v21 = vrot.slane %v61_v17, 2  ;;  %v58_v22 = vrot.slane %v57_v16, 1 }
  0xa6   :  { %v63_v23 = vmax.f32 %v61_v17, %v62_v21  ;;  %v59_v27 = vmax.f32 %v57_v16, %v58_v22  ;;  %v138_v22 = vld [vmem:[#allocation4] sm:$0x3] }
  0xa8   :  { %v64_v26 = vrot.slane %v63_v23, 1 }
  0xaa   :  { %v65_v29 = vmax.f32 %v63_v23, %v64_v26 }
  0xac   :  { %v69_v31 = vsel %vm68_vm3, %v65_v29, %v59_v27 }
  0xad   :  { %v71_v32 = vmax.f32 %v53_v28, %v69_v31 }
  0xaf   :  { %v72_v34 = vsub.f32 %v53_v28, %v71_v32  ;;  %v82_v35 = vrot.slane %v71_v32, %v81_v30  ;;  %178 = vst.msk [vmem:[#allocation2] sm:$0x3] %vm30_vm1, %v71_v32 }
  0xb1   :  { %v73_v36 = vmul.f32 1.442695, %v72_v34  ;;  %v83_v37 = vcombine.high %v82_v35, %v82_v35  ;;  %v90_v38 = vrot.slane %v82_v35, %v81_v30 }
  0xb3   :  { %218 = vpow2.f32 %v73_v36  ;;  %v97_v39 = vrot.slane %v83_v37, %v81_v30  ;;  %v101_v40 = vrot.slane %v90_v38, %v100_v33 }
  0xb5   :  { %v105_v41 = vrot.slane %v97_v39, %v100_v33  ;;  %v108_v42 = vsub.f32 %v49_v10, %v101_v40 }
  0xb7   :  { %v109_v43 = vsub.f32 %v52_v13, %v105_v41  ;;  %v110_v44 = vmul.f32 1.442695, %v108_v42 }
  0xb9   :  { %220 = vpow2.f32 %v110_v44  ;;  %v112_v45 = vmul.f32 1.442695, %v109_v43 }
  0xbb   :  { %222 = vpow2.f32 %v112_v45 }
  0xc0   :  { %v219_v46 = vpop.eup %218 }
  0xc1   :  { %141 = vperm.xlu0 %217, %v219_v46   ;;  %v115_v1 = vmul.f32 %v219_v46, %v114_v60 }
  0xc6   :  { %v221_v47 = vpop.eup %220 }
  0xc7   :  { %v117_v48 = vsel %vm116_vm4, %v221_v47, 0.0  ;;  %147 = vperm.xlu1 %216, %v221_v47  }
  0xc8   :  { %v223_v49 = vpop.eup %222  ;;  %v118_v50 = vrot.slane %v117_v48, 4 }
  0xc9   :  { %v124_v51 = vsel %vm116_vm4, %v223_v49, 0.0 }
  0xca   :  { %v119_v52 = vadd.f32 %v118_v50, %v117_v48  ;;  %v125_v53 = vrot.slane %v124_v51, 4 }
  0xcb   :  { %152 = vperm.xlu1 %216, %v223_v49  }
  0xcc   :  { %v120_v54 = vrot.slane %v119_v52, 2  ;;  %v126_v55 = vadd.f32 %v125_v53, %v124_v51 }
  0xce   :  { %v121_v56 = vadd.f32 %v120_v54, %v119_v52  ;;  %v127_v57 = vrot.slane %v126_v55, 2 }
  0xd0   :  { %v122_v58 = vrot.slane %v121_v56, 1  ;;  %v128_v59 = vadd.f32 %v127_v57, %v126_v55 }
  0xd2   :  { %v129_v61 = vrot.slane %v128_v59, 1  ;;  %v123_v62 = vadd.f32 %v122_v58, %v121_v56 }
  0xd4   :  { %v130_v63 = vadd.f32 %v129_v61, %v128_v59 }
  0xd6   :  { %v133_v3 = vsel %vm68_vm3, %v130_v63, %v123_v62 }
  0xd7   :  { %v135_v4 = vadd.f32 %v133_v3, %v115_v1 }
  0xd9   :  { %137 = vst.msk [vmem:[#allocation3] sm:$0x3] %vm30_vm1, %v135_v4 }
  0xe0   :  { %v182_v5 = vld [vmem:[#allocation3] sm:$0x3] }
  0xe1   :  { %224 = vrcp.f32 %v182_v5 }
  0xee   :  { %v225_v6 = vpop.eup %224 }
  0xef   :  { %187 = vperm.xlu1 %216, %v225_v6  }
 0x13c   :  { %v142_v23 = vpop.permute.xlu0 %141 }
 0x13d   :  { %v144_v26 = vmul.f32 %v142_v23, %v138_v22 }
 0x142   :  { %v148_v7 = vpop.permute.xlu1 %147 }
 0x143   :  { %v155_v8 = vmul.f32 %v148_v7, %v296_v0 }
 0x145   :  { %v157_v9 = vsel %vm46_vm0, %v155_v8, 0.0 }
 0x146   :  { %v158_v10 = vrot.slane %v157_v9, 4  ;;  %v153_v11 = vpop.permute.xlu1 %152 }
 0x147   :  { %v156_v12 = vmul.f32 %v153_v11, %v301_v2 }
 0x148   :  { %v159_v13 = vadd.f32 %v158_v10, %v157_v9 }
 0x149   :  { %v164_v14 = vsel %vm46_vm0, %v156_v12, 0.0 }
 0x14a   :  { %v160_v15 = vrot.slane %v159_v13, 2  ;;  %v165_v16 = vrot.slane %v164_v14, 4 }
 0x14c   :  { %v161_v17 = vadd.f32 %v160_v15, %v159_v13  ;;  %v166_v18 = vadd.f32 %v165_v16, %v164_v14 }
 0x14e   :  { %v167_v19 = vrot.slane %v166_v18, 2  ;;  %v162_v20 = vrot.slane %v161_v17, 1 }
 0x150   :  { %v168_v21 = vadd.f32 %v167_v19, %v166_v18  ;;  %v163_v0 = vadd.f32 %v162_v20, %v161_v17 }
 0x152   :  { %v169_v24 = vrot.slane %v168_v21, 1 }
 0x154   :  { %v170_v25 = vadd.f32 %v169_v24, %v168_v21 }
 0x156   :  { %v173_v27 = vsel %vm68_vm3, %v170_v25, %v163_v0 }
 0x157   :  { %v175_v28 = vadd.f32 %v173_v27, %v144_v26 }
 0x159   :  { %177 = vst.msk [vmem:[#allocation4] sm:$0x3] %vm33_vm2, %v175_v28 }
 0x160   :  { %v184_v2 = vld [vmem:[#allocation4] sm:$0x3] }
 0x16a   :  { %v188_v29 = vpop.permute.xlu1 %187 }
 0x16b   :  { %v190_v30 = vmul.f32 %v188_v29, %v184_v2 }
 0x16d   :  { %191 = vst.msk [vmem:[#allocation8] sm:$0x3] %vm33_vm2, %v190_v30 }
 0x16e   :  { %257 = shalt.err (!%p254_p9)
}
 0x16f   :  { %201 = dma.vmem_to_hbm [thread:$0]  %s199_s1, 32, %s326_s2, [#allocation7]  }
 0x170   :  { %268 = dma.done.wait [#allocation7], 32  }
 0x171   :  { %269 = vsyncadd [#allocation7], 4294967264 }
 0x172   :  { %205 = vsyncpa [#allocation6], 1 }
 0x173   :  { %206 = vsyncpa [#allocation7], 1 }

</bundles_post_ra>
